<compile_context>
chip_gen: v7x
topology: tpu7x:2x2x1
jax: 0.10.0
libtpu: 0.0.40
codegen_flags: <defaults>
</compile_context>

<pallas_src>
import jax
import jax.numpy as jnp
from jax.experimental import pallas as pl
from jax.experimental.pallas import tpu as pltpu

_MIB = 1024 * 1024


def _round_up(x: int, m: int) -> int:
    return ((x + m - 1) // m) * m


def _cdiv(a: int, b: int) -> int:
    return -(-a // b)


def _vmem_capacity_bytes() -> int:
    try:
        return int(pltpu.get_tpu_info().vmem_capacity_bytes)
    except Exception:
        return 64 * _MIB  # conservative fallback (v7x per-TensorCore VMEM)


def _block_spec(shape, index_map, buffers=None):
    """BlockSpec with optional explicit buffer count (falls back if unsupported)."""
    if buffers is None:
        return pl.BlockSpec(shape, index_map)
    try:
        return pl.BlockSpec(shape, index_map, pipeline_mode=pl.Buffered(buffers))
    except TypeError:
        return pl.BlockSpec(shape, index_map)


def _linear_kernel(x_ref, w_ref, b_ref, o_ref):
    # MXU matmul with f32 accumulate; VPU broadcast bias add; store.
    acc = jnp.dot(x_ref[...], w_ref[...], preferred_element_type=jnp.float32)
    o_ref[...] = (acc + b_ref[...].astype(jnp.float32)).astype(o_ref.dtype)


def _pad_n_out(n_out: int) -> int:
    # Tiny heads stay unpadded (full-extent last dim is legal and avoids a 16x
    # writeback blowup); realistic heads get lane-dense 128-multiple padding.
    if n_out < 128:
        return n_out
    return _round_up(n_out, 128)


def prepare_linear_params(weight, bias):
    """One-time layout plumbing: weight.T + lane padding, bias padding."""
    n_out, nz = weight.shape
    dtype = weight.dtype
    n_out_p = _pad_n_out(n_out)
    w_p = jnp.zeros((nz, n_out_p), dtype=dtype).at[:, :n_out].set(weight.T)
    b_p = jnp.zeros((1, n_out_p), dtype=dtype).at[0, :n_out].set(bias.astype(dtype))
    return w_p, b_p, n_out


def _choose_col_tile(nz: int, n_out_p: int, itemsize: int, w_cap_bytes: int) -> int:
    """Column tile (multiple of 128 dividing n_out_p) keeping weight tile <= cap."""
    if n_out_p % 128 != 0:
        return n_out_p
    if nz * n_out_p * itemsize <= w_cap_bytes:
        return n_out_p
    m = n_out_p // 128
    best = 1
    for d in range(1, m + 1):
        if m % d == 0 and 128 * d * nz * itemsize <= w_cap_bytes:
            best = d
    return 128 * best


def linear_pallas(x, w_p, b_p, n_out, *, block_b_cap: int = 4096):
    """y = x @ w_p + b_p, then strip padding. w_p/b_p from prepare_linear_params."""
    B, nz = x.shape
    nz_w, n_out_p = w_p.shape
    assert nz_w == nz, "weight inner dim must match x feature dim"
    dtype = x.dtype
    itemsize = jnp.dtype(dtype).itemsize

    # --- Generation-aware VMEM budget (v7x: 64 MiB, v5e/v6e: 128 MiB). ---
    vmem_cap = _vmem_capacity_bytes()
    budget = min(vmem_cap - 16 * _MIB, int(0.75 * vmem_cap))  # ~48 MiB / ~96 MiB

    # --- Column tiling for wide heads keeps the resident weight under ~8 MiB. ---
    tn = _choose_col_tile(nz, n_out_p, itemsize, w_cap_bytes=8 * _MIB)
    grid_j = n_out_p // tn
    w_bufs = 1 if grid_j == 1 else 2  # grid-invariant -> single buffer
    resident_bytes = w_bufs * (nz * tn + 8 * max(tn, 128)) * itemsize

    # --- Batch tile: sized by bytes after subtracting resident weight/bias. ---
    bytes_per_row = (nz + tn) * itemsize
    tile_budget = max(budget - resident_bytes, 2 * _MIB)
    max_tb_vmem = tile_budget // (2 * bytes_per_row)  # double-buffered x + y tiles
    target_step_bytes = 8 * _MIB                       # amortize ~0.35us/step overhead
    tb_cap = min(block_b_cap, max(1, target_step_bytes // bytes_per_row), max_tb_vmem)
    tb_cap = max(8, (tb_cap // 8) * 8)

    # Balanced batch tiles (pad waste <= 7 rows per tile); force >=2 tiles for
    # large B so v7x megacore sharding has work on both TensorCores.
    num_tiles = max(1, _cdiv(B, tb_cap))
    if num_tiles == 1 and B >= 1024:
        num_tiles = 2
    tb = _round_up(_cdiv(B, num_tiles), 8)
    B_p = tb * num_tiles
    grid_b = num_tiles

    x_p = x if B_p == B else jnp.zeros((B_p, nz), dtype=dtype).at[:B, :].set(x)

    # Explicit VMEM limit: actual footprint with headroom, clamped to physical.
    footprint = 2 * tb * bytes_per_row + resident_bytes
    vmem_limit = int(min(vmem_cap - 8 * _MIB, max(32 * _MIB, 2 * footprint)))

    y_p = pl.pallas_call(
        _linear_kernel,
        out_shape=jax.ShapeDtypeStruct((B_p, n_out_p), dtype),
        grid_spec=pltpu.PrefetchScalarGridSpec(
            num_scalar_prefetch=0,
            grid=(grid_b, grid_j),
            in_specs=[
                # x tile marches down the batch axis (invariant over columns).
                pl.BlockSpec((tb, nz), lambda i, j: (i, 0)),
                # weight / bias tiles: resident across the batch axis.
                _block_spec((nz, tn), lambda i, j: (0, j), buffers=w_bufs),
                _block_spec((1, tn), lambda i, j: (0, j), buffers=w_bufs),
            ],
            out_specs=pl.BlockSpec((tb, tn), lambda i, j: (i, j)),
        ),
        compiler_params=pltpu.CompilerParams(
            dimension_semantics=("parallel", "parallel"),
            vmem_limit_bytes=vmem_limit,
        ),
    )(x_p, w_p, b_p)

    # Strip batch padding and (if any) lane padding of the output head.
    return y_p[:B, :n_out]


class SimpleClassifier:
    """Pallas TPU equivalent of Simple_Classifier (nn.Linear(nz, n_out))."""

    def __init__(self, weight, bias):
        # Parameters transposed/padded once; reused across forward calls.
        self.w_p, self.b_p, self.n_out = prepare_linear_params(weight, bias)

    def __call__(self, x):
        return linear_pallas(x, self.w_p, self.b_p, self.n_out)


def simple_classifier_forward(x, weight, bias):
    """One-shot convenience wrapper (prepares params each call)."""
    w_p, b_p, n_out = prepare_linear_params(weight, bias)
    return linear_pallas(x, w_p, b_p, n_out)


if __name__ == "__main__":
    # Module config: nz (latent dim), n_out (number of classes).
    nz, n_out = 32, 8
    batch = 4

    key = jax.random.PRNGKey(0)
    kx, kw, kb = jax.random.split(key, 3)

    # Deterministic synthetic parameters in PyTorch Linear layout.
    weight = jax.random.normal(kw, (n_out, nz), dtype=jnp.float32) * 0.1  # [n_out, nz]
    bias = jax.random.normal(kb, (n_out,), dtype=jnp.float32) * 0.1       # [n_out]
    x = jax.random.normal(kx, (batch, nz), dtype=jnp.float32)             # [B, nz]

    clf = SimpleClassifier(weight, bias)   # params prepared once
    y = jax.block_until_ready(clf(x))

    # Reference check in plain JAX (same math as nn.Linear).
    y_ref = x @ weight.T + bias[None, :]
    assert y.shape == (batch, n_out)
    assert jnp.allclose(y, y_ref, atol=1e-5, rtol=1e-5)

    print("KERNEL_OK")
</pallas_src>

<mosaic_0001>
module attributes {stable_mosaic.version = 11 : i64} {
  func.func @_linear_kernel(%arg0: i32, %arg1: i32, %arg2: memref<8x32xf32, #tpu.memory_space<vmem>>, %arg3: memref<32x8xf32, #tpu.memory_space<vmem>>, %arg4: memref<1x8xf32, #tpu.memory_space<vmem>>, %arg5: memref<8x8xf32, #tpu.memory_space<vmem>>) attributes {dimension_semantics = [#tpu.dimension_semantics<parallel>, #tpu.dimension_semantics<parallel>], iteration_bounds = array<i64: 1, 1>, scalar_prefetch = 0 : i64, scratch_operands = 0 : i64, tpu.core_type = #tpu.core_type<tc>, window_params = [{transform_indices = @transform_0, window_bounds = array<i64: 8, 32>}, {pipeline_mode = #tpu.pipeline_mode<synchronous>, transform_indices = @transform_1, window_bounds = array<i64: 32, 8>}, {pipeline_mode = #tpu.pipeline_mode<synchronous>, transform_indices = @transform_2, window_bounds = array<i64: 1, 8>}, {transform_indices = @transform_3, window_bounds = array<i64: 8, 8>}]} {
    %c0 = arith.constant 0 : index
    %c0_0 = arith.constant 0 : index
    %0 = vector.load %arg2[%c0, %c0_0] : memref<8x32xf32, #tpu.memory_space<vmem>>, vector<8x32xf32>
    %c0_1 = arith.constant 0 : index
    %c0_2 = arith.constant 0 : index
    %1 = vector.load %arg3[%c0_1, %c0_2] : memref<32x8xf32, #tpu.memory_space<vmem>>, vector<32x8xf32>
    %cst = arith.constant dense<0.000000e+00> : vector<8x8xf32>
    %2 = tpu.matmul %0, %1, %cst {dimension_numbers = #tpu.dot_dimension_numbers<[1], [0], [0], [1], [0, 0, 1, 1], [], []>} : vector<8x32xf32>, vector<32x8xf32>, vector<8x8xf32> -> vector<8x8xf32>
    %c0_3 = arith.constant 0 : index
    %c0_4 = arith.constant 0 : index
    %3 = vector.load %arg4[%c0_3, %c0_4] : memref<1x8xf32, #tpu.memory_space<vmem>>, vector<1x8xf32>
    %4 = vector.broadcast %3 : vector<1x8xf32> to vector<8x8xf32>
    %5 = arith.addf %2, %4 : vector<8x8xf32>
    %c0_5 = arith.constant 0 : index
    %c0_6 = arith.constant 0 : index
    %6 = vector.load %arg5[%c0_5, %c0_6] : memref<8x8xf32, #tpu.memory_space<vmem>>, vector<8x8xf32>
    tpu.vector_store %arg5[%c0_5, %c0_6], %5 {strides = array<i32>} : memref<8x8xf32, #tpu.memory_space<vmem>>, vector<8x8xf32>,
    return
  }
  func.func @transform_0(%arg0: i32, %arg1: i32) -> (i32, i32) {
    %c0_i32 = arith.constant 0 : i32
    %c0_i32_0 = arith.constant 0 : i32
    return %arg0, %c0_i32 : i32, i32
  }
  func.func @transform_1(%arg0: i32, %arg1: i32) -> (i32, i32) {
    %c0_i32 = arith.constant 0 : i32
    %c0_i32_0 = arith.constant 0 : i32
    return %c0_i32, %arg1 : i32, i32
  }
  func.func @transform_2(%arg0: i32, %arg1: i32) -> (i32, i32) {
    %c0_i32 = arith.constant 0 : i32
    %c0_i32_0 = arith.constant 0 : i32
    return %c0_i32, %arg1 : i32, i32
  }
  func.func @transform_3(%arg0: i32, %arg1: i32) -> (i32, i32) {
    %c0_i32 = arith.constant 0 : i32
    return %arg0, %arg1 : i32, i32
  }
}

</mosaic_0001>

<bundles_post_ra>
// kernel: tpu_custom_call.1
= control target key start
LH: loop header
LB: loop body
LE: loop exit
PB: predicated region body
PF: predicated region fallthrough
CT: control target
= control target key end

     0   :  { %v169_v3 = vmov 0.0|0.0   ;;  %vm170_vm0 = vmmov 0   ;;  %v171_v6 = vmov 0.0   ;;  %s223_s0 = inlined_call_operand.vmem [shape: f32[8,32], index: 0, kind: input, shape index: {}]   ;;  %s224_s1 = inlined_call_operand.vmem [shape: f32[32,8], index: 1, kind: input, shape index: {}]   ;;  %s225_s2 = inlined_call_operand.vmem [shape: f32[1,8], index: 2, kind: input, shape index: {}]   ;;  %s226_s3 = inlined_call_operand.hbm [shape: f32[8,8], index: 3, kind: output, shape index: {}]  }
   0x1   :  { %v16_v0 = vld [vmem:[%s224_s1] sm:$0xff]  ;;  %v17_v1 = vld [vmem:[%s224_s1 + $0x8] sm:$0xff]  ;;  %v18_v2 = vld [vmem:[%s224_s1 + $0x10] sm:$0xff]  ;;  %135 = vmatprep.subr.bf16.mxu0 %v169_v3  ;;  %132 = vmatprep.mubr.msk.f32.mxu0 %vm170_vm0, %v171_v6 }
   0x2   :  { %v136_v4 = vpack.c.bf16 %v17_v1, %v16_v0  ;;  %v19_v5 = vld [vmem:[%s224_s1 + $0x18] sm:$0xff] }
   0x3   :  { %8 = vsyncpa [#allocation3], 0  ;;  %v139_v7 = vpack.c.bf16 %v19_v5, %v18_v2  ;;  %v15_v8 = vld [vmem:[%s223_s0] sm:$0xff]  ;;  %vm27_vm1 = vcmask 261120   ;;  %s172_s24 = smov [#allocation2]   ;;  %vm101_vm2 = vcmask 64512  }
   0x4   :  { %137 = vmatpush3.bf16.msra.mxu0 %v136_v4  ;;  %v117_v9 = vld [vmem:[%s225_s2] ss:$0 sm:$0xff]  ;;  %s109_s1 = sshll.u32 %s172_s24, 4  ;;  %s110_s1 = int_to_ptr.vmem [resolvable:$true] %s109_s1 }
   0x5   :  { %138 = vmatprep.subr.bf16.mxu0 %v169_v3  ;;  %s145_s25 = scalar_lea.vmem %s110_s1, 128  ;;  %p150_p1 = scmp.lt.s32.totalorder %s110_s1, %s110_s1 }
   0x6   :  { %p146_p0 = scmp.ne.s32.totalorder %s110_s1, %s145_s25  ;;  %p151_p2 = scmp.lt.s32.totalorder %s145_s25, %s145_s25 }
   0x8   :  { %140 = vmatpush3.bf16.msra.mxu0 %v139_v7  ;;  %p152_p3 = por %p151_p2, %p150_p1 }
   0xa   :  { %p153_p4 = pnand %p152_p3, %p146_p0 }
   0xb   :  { %133 = vmatmul.mubr.msk.f32.vlgmr.msra.gmra.mrb[0].mxu0 %vm27_vm1, %v15_v8 }
  0xde   :  { %v97_v10 = vpop.f32.mrb[0].mxu0 }
  0xdf   :  { %v98_v11 = vadd.f32 %v117_v9, %v97_v10  ;;  %v134_v12 = vpop.f32.mrb[1].mxu0 }
  0xe1   :  { %102 = vst.msk [vmem:[#allocation2] sm:$0xff] %vm101_vm2, %v98_v11 }
  0xe2   :  { %156 = shalt.err (!%p153_p4)
}
  0xe3   :  { %s157_s27 = scalar_lea.hbm %s226_s3, 128 }
  0xe4   :  { %p158_p5 = scmp.ne.s32.totalorder %s226_s3, %s157_s27  ;;  %p161_p6 = scmp.lt.u32.totalorder %s157_s27, %s226_s3 }
  0xe6   :  { %p163_p7 = pnand %p161_p6, %p158_p5 }
  0xe8   :  { %166 = shalt.err (!%p163_p7)
}
  0xe9   :  { %112 = dma.vmem_to_hbm [thread:$0]  %s110_s1, 128, %s226_s3, [#allocation3]  }
  0xea   :  { %167 = dma.done.wait [#allocation3], 128  }
  0xeb   :  { %168 = vsyncadd [#allocation3], 4294967168 }
  0xec   :  { %116 = vsyncpa [#allocation3], 1 }

</bundles_post_ra>
